<compile_context>
chip_gen: v7x
topology: tpu7x:2x2x1
jax: 0.10.0
libtpu: 0.0.40
codegen_flags: <defaults>
</compile_context>

<pallas_src>
import math
from functools import partial

import numpy as np
import jax
import jax.numpy as jnp
from jax.experimental import pallas as pl
from jax.experimental.pallas import tpu as pltpu


def build_pe_table(d_model: int, max_seq_len: int = 50) -> jnp.ndarray:
    """Reproduces the PyTorch buffer exactly (note: uses 2*i, not i, in the exponent)."""
    assert d_model % 2 == 0, "d_model must be even (PE table writes pairs i, i+1)"
    pe = np.zeros((max_seq_len, d_model), dtype=np.float32)
    for pos in range(max_seq_len):
        for i in range(0, d_model, 2):
            pe[pos, i] = math.sin(pos / 10000 ** (2 * i / d_model))
            pe[pos, i + 1] = math.cos(pos / 10000 ** (2 * (i + 1) / d_model))
    return jnp.asarray(pe)  # (max_seq_len, d_model), float32


def _pe_kernel(x_ref, pe_ref, o_ref, *, scale):
    # x_ref:  (B, tF)  lane-dense chunk of the flattened (B, S*D) activation
    # pe_ref: (1, tF)  matching chunk of the flattened PE table (broadcast over rows)
    x = x_ref[...].astype(jnp.float32)
    pe = pe_ref[...].astype(jnp.float32)
    o_ref[...] = (x * scale + pe).astype(o_ref.dtype)


def _choose_f_tile(B: int, F: int, itemsize: int, target_bytes: int = 2 << 20) -> int:
    """Pick a lane-dense tile along the flattened S*D axis (~2 MiB blocks)."""
    if B * F * itemsize <= target_bytes:
        return F  # whole array in one block -> single grid step for tiny problems
    tf = (target_bytes // (B * itemsize)) // 128 * 128
    return int(max(128, min(tf, F)))


def positional_encoding(x: jnp.ndarray, pe_table: jnp.ndarray) -> jnp.ndarray:
    """x: (B, S, D); pe_table: (max_seq_len, D) float32. Returns (B, S, D) in x.dtype."""
    B, S, D = x.shape
    max_len, d_model = pe_table.shape
    assert D == d_model, f"d_model mismatch: x has {D}, pe_table has {d_model}"
    assert S <= max_len, f"seq_len {S} exceeds max_seq_len {max_len}"
    scale = math.sqrt(float(d_model))

    # Lane-dense flattening: minor dim becomes S*D (multiple of 128 whenever D or S*D is).
    F = S * D
    x2 = x.reshape(B, F)
    pe2 = pe_table[:S, :].reshape(1, F)  # float32, shared across batch rows

    tF = _choose_f_tile(B, F, jnp.dtype(x.dtype).itemsize)
    grid_f = pl.cdiv(F, tF)

    kernel = partial(_pe_kernel, scale=scale)

    out2 = pl.pallas_call(
        kernel,
        out_shape=jax.ShapeDtypeStruct((B, F), x.dtype),
        grid_spec=pltpu.PrefetchScalarGridSpec(
            num_scalar_prefetch=0,
            grid=(grid_f,),
            in_specs=[
                pl.BlockSpec((B, tF), lambda f: (0, f)),   # x chunk
                pl.BlockSpec((1, tF), lambda f: (0, f)),   # matching pe chunk
            ],
            out_specs=pl.BlockSpec((B, tF), lambda f: (0, f)),
        ),
        compiler_params=pltpu.CompilerParams(
            dimension_semantics=("parallel",),  # independent chunks; megacore-shardable
        ),
    )(x2, pe2)

    return out2.reshape(B, S, D)


if __name__ == "__main__":
    # Small shapes consistent with the module's forward: (batch, seq, d_model)
    batch, seq, d_model = 2, 8, 32
    max_seq_len = 50

    key = jax.random.PRNGKey(0)
    x = jax.random.normal(key, (batch, seq, d_model), dtype=jnp.float32)

    pe_table = build_pe_table(d_model, max_seq_len)

    out = positional_encoding(x, pe_table)
    out = jax.block_until_ready(out)

    # Reference check in plain JAX (same math as the PyTorch forward).
    ref = x * math.sqrt(d_model) + pe_table[None, :seq, :]
    np.testing.assert_allclose(np.asarray(out), np.asarray(ref), rtol=1e-6, atol=1e-6)

    print("KERNEL_OK")
</pallas_src>

<mosaic_0001>
module attributes {stable_mosaic.version = 11 : i64} {
  func.func @_pe_kernel(%arg0: i32, %arg1: memref<2x256xf32, #tpu.memory_space<vmem>>, %arg2: memref<1x256xf32, #tpu.memory_space<vmem>>, %arg3: memref<2x256xf32, #tpu.memory_space<vmem>>) attributes {dimension_semantics = [#tpu.dimension_semantics<parallel>], iteration_bounds = array<i64: 1>, scalar_prefetch = 0 : i64, scratch_operands = 0 : i64, tpu.core_type = #tpu.core_type<tc>, window_params = [{transform_indices = @transform_0, window_bounds = array<i64: 2, 256>}, {transform_indices = @transform_1, window_bounds = array<i64: 1, 256>}, {transform_indices = @transform_2, window_bounds = array<i64: 2, 256>}]} {
    %c0 = arith.constant 0 : index
    %c0_0 = arith.constant 0 : index
    %0 = vector.load %arg1[%c0, %c0_0] : memref<2x256xf32, #tpu.memory_space<vmem>>, vector<2x256xf32>
    %c0_1 = arith.constant 0 : index
    %c0_2 = arith.constant 0 : index
    %1 = vector.load %arg2[%c0_1, %c0_2] : memref<1x256xf32, #tpu.memory_space<vmem>>, vector<1x256xf32>
    %cst = arith.constant 5.65685415 : f32
    %2 = vector.broadcast %cst : f32 to vector<2x256xf32>
    %3 = arith.mulf %0, %2 : vector<2x256xf32>
    %4 = vector.broadcast %1 : vector<1x256xf32> to vector<2x256xf32>
    %5 = arith.addf %3, %4 : vector<2x256xf32>
    %c0_3 = arith.constant 0 : index
    %c0_4 = arith.constant 0 : index
    %6 = vector.load %arg3[%c0_3, %c0_4] : memref<2x256xf32, #tpu.memory_space<vmem>>, vector<2x256xf32>
    tpu.vector_store %arg3[%c0_3, %c0_4], %5 {strides = array<i32>} : memref<2x256xf32, #tpu.memory_space<vmem>>, vector<2x256xf32>,
    return
  }
  func.func @transform_0(%arg0: i32) -> (i32, i32) {
    %c0_i32 = arith.constant 0 : i32
    %c0_i32_0 = arith.constant 0 : i32
    return %c0_i32, %arg0 : i32, i32
  }
  func.func @transform_1(%arg0: i32) -> (i32, i32) {
    %c0_i32 = arith.constant 0 : i32
    %c0_i32_0 = arith.constant 0 : i32
    return %c0_i32, %arg0 : i32, i32
  }
  func.func @transform_2(%arg0: i32) -> (i32, i32) {
    %c0_i32 = arith.constant 0 : i32
    %c0_i32_0 = arith.constant 0 : i32
    return %c0_i32, %arg0 : i32, i32
  }
}

</mosaic_0001>

<bundles_post_ra>
// kernel: tpu_custom_call.1
= control target key start
LH: loop header
LB: loop body
LE: loop exit
PB: predicated region body
PF: predicated region fallthrough
CT: control target
= control target key end

     0   :  { %7 = vsyncpa [#allocation3], 0  ;;  %s158_s0 = inlined_call_operand.hbm [shape: f32[2,256], index: 0, kind: input, shape index: {}]   ;;  %s159_s1 = inlined_call_operand.vmem [shape: f32[1,256], index: 1, kind: input, shape index: {}]   ;;  %s160_s2 = inlined_call_operand.hbm [shape: f32[2,256], index: 2, kind: output, shape index: {}]  }
   0x1   :  { %8 = vsyncpa [#allocation4], 0  ;;  %s113_s9 = smov [#allocation2]   ;;  %s65_s13 = scalar_lea.hbm %s158_s0, 64 }
   0x2   :  { %s15_s10 = sshll.u32 %s113_s9, 4  ;;  %p66_p0 = scmp.ne.s32.totalorder %s158_s0, %s65_s13  ;;  %s16_s10 = int_to_ptr.vmem [resolvable:$true] %s15_s10 }
   0x3   :  { %p69_p1 = scmp.lt.u32.totalorder %s65_s13, %s158_s0 }
   0x5   :  { %p71_p2 = pnand %p69_p1, %p66_p0 }
   0x7   :  { %74 = shalt.err (!%p71_p2)
}
   0x8   :  { %s75_s18 = scalar_lea.vmem %s16_s10, 64  ;;  %p80_p4 = scmp.lt.s32.totalorder %s16_s10, %s16_s10 }
   0x9   :  { %p76_p3 = scmp.ne.s32.totalorder %s16_s10, %s75_s18  ;;  %p81_p5 = scmp.lt.s32.totalorder %s75_s18, %s75_s18 }
   0xb   :  { %p82_p6 = por %p81_p5, %p80_p4 }
   0xd   :  { %p83_p7 = pnand %p82_p6, %p76_p3 }
   0xf   :  { %86 = shalt.err (!%p83_p7)
}
  0x10   :  { %18 = dma.hbm_to_vmem [thread:$0]  %s158_s0, 64, %s16_s10, [#allocation3]  }
  0x11   :  { %109 = dma.done.wait [#allocation3], 64  }
  0x12   :  { %110 = vsyncadd [#allocation3], 4294967232  ;;  %v28_v0 = vlaneseq  ;;  %v114_v1 = vmov 1983009808   ;;  %v24_v7 = vld [vmem:[#allocation2] sm:$0xf] }
  0x13   :  { %v38_v2 = vunpack.c.l.s4 %v114_v1  ;;  %v25_v8 = vld [vmem:[%s159_s1] sm:$0x3]  ;;  %v26_v12 = vmul.f32 5.656854, %v24_v7  ;;  %s115_s0 = smov [#allocation5]  }
  0x14   :  { %v29_v3 = vshrl.u32 %v28_v0, 7  ;;  %s53_s23 = sshll.u32 %s115_s0, 4  ;;  %s54_s23 = int_to_ptr.vmem [resolvable:$true] %s53_s23 }
  0x15   :  { %v39_v6 = vunpack.c.0.s8 %v38_v2  ;;  %s87_s24 = scalar_lea.vmem %s54_s23, 64  ;;  %p92_p9 = scmp.lt.s32.totalorder %s54_s23, %s54_s23 }
  0x16   :  { %v30_v4 = vsub.s32 0, %v29_v3  ;;  %v34_v5 = vsub.s32 1, %v29_v3  ;;  %p88_p8 = scmp.ne.s32.totalorder %s54_s23, %s87_s24  ;;  %p93_p10 = scmp.lt.s32.totalorder %s87_s24, %s87_s24 }
  0x17   :  { %v42_v11 = vsub.s32 %v39_v6, %v29_v3 }
  0x18   :  { %v31_v9 = vrot.slane %v25_v8, %v30_v4  ;;  %v35_v10 = vrot.slane %v25_v8, %v34_v5  ;;  %p94_p11 = por %p93_p10, %p92_p9 }
  0x1a   :  { %v36_v13 = vcombine.low %v31_v9, %v35_v10  ;;  %p95_p12 = pnand %p94_p11, %p88_p8 }
  0x1c   :  { %v43_v14 = vrot.slane %v36_v13, %v42_v11 }
  0x1e   :  { %v45_v15 = vadd.f32 %v43_v14, %v26_v12 }
  0x20   :  { %46 = vst [vmem:[#allocation5] sm:$0xf] %v45_v15 }
  0x21   :  { %98 = shalt.err (!%p95_p12)
}
  0x22   :  { %s99_s26 = scalar_lea.hbm %s160_s2, 64 }
  0x23   :  { %p100_p13 = scmp.ne.s32.totalorder %s160_s2, %s99_s26  ;;  %p103_p0 = scmp.lt.u32.totalorder %s99_s26, %s160_s2 }
  0x25   :  { %p105_p1 = pnand %p103_p0, %p100_p13 }
  0x27   :  { %108 = shalt.err (!%p105_p1)
}
  0x28   :  { %56 = dma.vmem_to_hbm [thread:$0]  %s54_s23, 64, %s160_s2, [#allocation4]  }
  0x29   :  { %111 = dma.done.wait [#allocation4], 64  }
  0x2a   :  { %112 = vsyncadd [#allocation4], 4294967232 }
  0x2b   :  { %60 = vsyncpa [#allocation3], 1 }
  0x2c   :  { %61 = vsyncpa [#allocation4], 1 }

</bundles_post_ra>
